<compile_context>
chip_gen: v7x
topology: tpu7x:2x2x1
jax: 0.10.0
libtpu: 0.0.40
codegen_flags: <defaults>
</compile_context>

<pallas_src>
import functools

import jax
import jax.numpy as jnp
from jax.experimental import pallas as pl
from jax.experimental.pallas import tpu as pltpu

LANES = 128                  # vreg lane width
MAX_TILE_ROWS = 4096         # 4096 x 128 f32 = 2 MiB per input per pipeline buffer
MIN_SPLIT_ROWS = 4096        # add the 2-way split axis only when each half has >= this many rows
VMEM_LIMIT_BYTES = 32 * 1024 * 1024   # explicit scoped-VMEM budget, safe on v5e/v6e/v7x


def _cdiv(a, b):
    return -(-a // b)


def _round_up(a, m):
    return _cdiv(a, m) * m


def _sublane_group(dtype):
    """Native sublane granularity for streaming a block of this dtype."""
    if dtype == jnp.float32:
        return 8
    if dtype == jnp.bfloat16:
        return 16          # bf16 min tile is (16, 128)
    return None            # anything else: wrapper casts to f32 first


def _accumulate_block(p_ref, t_ref, acc_ref, row_start, rows, group, masked):
    """One fused pass over the block: fold onto six (group, 128) vector partials."""
    tile_rows = p_ref.shape[0]
    n_groups = tile_rows // group
    zeros = jnp.zeros((group, LANES), jnp.float32)
    sub_rows = jax.lax.broadcasted_iota(jnp.int32, (group, LANES), 0)

    def body(j, carry):
        sp, st, spt, sp2, st2, sd2 = carry
        off = pl.multiple_of(j * group, group)
        pv = p_ref[pl.ds(off, group), :].astype(jnp.float32)
        tv = t_ref[pl.ds(off, group), :].astype(jnp.float32)
        if masked:
            # Zero rows whose global index is past the true row count; the raw
            # values there are undefined (partial / clamped boundary block).
            valid = (row_start + off + sub_rows) < rows
            pv = jnp.where(valid, pv, 0.0)
            tv = jnp.where(valid, tv, 0.0)
        d = pv - tv
        return (sp + pv, st + tv, spt + pv * tv,
                sp2 + pv * pv, st2 + tv * tv, sd2 + d * d)

    sp, st, spt, sp2, st2, sd2 = jax.lax.fori_loop(
        0, n_groups, body, (zeros,) * 6, unroll=min(4, n_groups))

    acc_ref[0] += sp
    acc_ref[1] += st
    acc_ref[2] += spt
    acc_ref[3] += sp2
    acc_ref[4] += st2
    acc_ref[5] += sd2


def _sums_kernel(p_ref, t_ref, out_ref, acc_ref, *, rows, group):
    c = pl.program_id(0)          # TensorCore split
    i = pl.program_id(1)          # streaming step within the split
    steps = pl.num_programs(1)
    tile_rows = p_ref.shape[0]
    row_start = (c * steps + i) * tile_rows

    @pl.when(i == 0)
    def _init():
        acc_ref[...] = jnp.zeros_like(acc_ref)

    block_full = row_start + tile_rows <= rows

    @pl.when(block_full)
    def _full_block():            # common case: no masking overhead
        _accumulate_block(p_ref, t_ref, acc_ref, row_start, rows, group, masked=False)

    @pl.when(jnp.logical_not(block_full))
    def _ragged_block():          # boundary (or fully-clamped) block: mask rows >= rows
        _accumulate_block(p_ref, t_ref, acc_ref, row_start, rows, group, masked=True)

    @pl.when(i == steps - 1)
    def _finalize():
        out_ref[0] = acc_ref[...]


def _partial_sums(p2, t2, rows, group, tile_rows, num_splits, steps):
    last_block = max(_cdiv(rows, tile_rows) - 1, 0)

    def in_index(c, i):
        # Clamp so a (rare) fully-out-of-range trailing block never issues an
        # OOB DMA; its contribution is masked to zero inside the kernel.
        return (jnp.minimum(c * steps + i, last_block), 0)

    in_spec = pl.BlockSpec((tile_rows, LANES), in_index)
    kernel = functools.partial(_sums_kernel, rows=rows, group=group)

    return pl.pallas_call(
        kernel,
        out_shape=jax.ShapeDtypeStruct((num_splits, 6, group, LANES), jnp.float32),
        grid_spec=pltpu.PrefetchScalarGridSpec(
            num_scalar_prefetch=0,
            grid=(num_splits, steps),
            in_specs=[in_spec, in_spec],
            out_specs=pl.BlockSpec((1, 6, group, LANES), lambda c, i: (c, 0, 0, 0)),
            scratch_shapes=[pltpu.VMEM((6, group, LANES), jnp.float32)],
        ),
        compiler_params=pltpu.CompilerParams(
            # TODO(synk): verify via a trace that the leading axis shards across
            # both v7x TensorCores; if not, switch to pltpu.CORE_PARALLEL.
            dimension_semantics=("parallel", "arbitrary"),
            vmem_limit_bytes=VMEM_LIMIT_BYTES,
        ),
    )(p2, t2)


def _tiling(rows, group):
    """Pick (tile_rows, num_splits, steps); the grid may over-cover `rows`
    (the excess is masked in-kernel), but a block never exceeds the array."""
    num_splits = 2 if rows >= 2 * MIN_SPLIT_ROWS else 1
    per_split = _cdiv(rows, num_splits)
    tile_rows = min(MAX_TILE_ROWS, _round_up(per_split, group))
    tile_rows = min(tile_rows, (rows // group) * group)   # keep block inside array
    steps = _cdiv(per_split, tile_rows)
    return tile_rows, num_splits, steps


def _reference_loss(predictions, targets):
    """Plain-JAX reference / small-n fast path (matches the PyTorch module)."""
    p = jnp.ravel(predictions).astype(jnp.float32)
    t = jnp.ravel(targets).astype(jnp.float32)
    n = jnp.float32(p.shape[0])
    mse = jnp.mean((p - t) ** 2)
    sx, sy = jnp.sum(p), jnp.sum(t)
    sxy, sx2, sy2 = jnp.sum(p * t), jnp.sum(p * p), jnp.sum(t * t)
    pearson = (n * sxy - sx * sy) / jnp.sqrt((n * sx2 - sx**2) * (n * sy2 - sy**2))
    return mse + (1.0 - pearson)


def combined_loss(predictions, targets, *, min_pallas_elements=65536):
    """MSE(mean) + (1 - Pearson) over the fully-flattened signals."""
    p = jnp.ravel(predictions)
    t = jnp.ravel(targets)
    n = p.shape[0]
    assert t.shape[0] == n, "predictions and targets must have the same element count"

    group = _sublane_group(p.dtype) if p.dtype == t.dtype else None
    if group is None:
        p = p.astype(jnp.float32)
        t = t.astype(jnp.float32)
        group = 8

    rows = _cdiv(n, LANES)
    # Small-n fast path: pallas launch / pipeline warm-up would dominate.
    if n < min_pallas_elements or rows < group:
        return _reference_loss(predictions, targets)

    rem = n % LANES
    if rem:
        # Only copy when the flat length is not lane-aligned; zero padding
        # contributes nothing to any sufficient statistic.
        pad = LANES - rem
        p = jnp.pad(p, (0, pad))
        t = jnp.pad(t, (0, pad))
    p2 = p.reshape(rows, LANES)
    t2 = t.reshape(rows, LANES)

    tile_rows, num_splits, steps = _tiling(rows, group)
    partials = _partial_sums(p2, t2, rows, group, tile_rows, num_splits, steps)
    sums = jnp.sum(partials, axis=(0, 2, 3))        # (6,) scalars
    sum_x, sum_y, sum_xy, sum_x2, sum_y2, sum_d2 = (sums[k] for k in range(6))

    nf = jnp.float32(n)
    mse = sum_d2 / nf                               # exact sum((x-y)^2), no cancellation
    pearson = (nf * sum_xy - sum_x * sum_y) / jnp.sqrt(
        (nf * sum_x2 - sum_x * sum_x) * (nf * sum_y2 - sum_y * sum_y)
    )
    return mse + (1.0 - pearson)


if __name__ == "__main__":
    key = jax.random.PRNGKey(0)
    kp, kt, kp2, kt2 = jax.random.split(key, 4)

    # rPPG-style signals: (batch=2, chunks=8, seq=128) -> 2048 samples flattened.
    predictions = jax.random.normal(kp, (2, 8, 128), dtype=jnp.float32)
    targets = 0.7 * predictions + 0.3 * jax.random.normal(kt, (2, 8, 128), dtype=jnp.float32)

    total = jax.block_until_ready(combined_loss(predictions, targets, min_pallas_elements=0))
    ref = jax.block_until_ready(_reference_loss(predictions, targets))
    assert jnp.allclose(total, ref, rtol=1e-4, atol=1e-4), (total, ref)

    # Lane-unaligned size: exercises the minimal pad + in-kernel row masking path.
    p_odd = jax.random.normal(kp2, (3, 5, 97), dtype=jnp.float32)
    t_odd = 0.5 * p_odd + 0.5 * jax.random.normal(kt2, (3, 5, 97), dtype=jnp.float32)
    total_odd = jax.block_until_ready(combined_loss(p_odd, t_odd, min_pallas_elements=0))
    ref_odd = jax.block_until_ready(_reference_loss(p_odd, t_odd))
    assert jnp.allclose(total_odd, ref_odd, rtol=1e-4, atol=1e-4), (total_odd, ref_odd)

    # bf16-native streaming path (halved HBM read traffic; f32 accumulation).
    p_bf = predictions.astype(jnp.bfloat16)
    t_bf = targets.astype(jnp.bfloat16)
    total_bf = jax.block_until_ready(combined_loss(p_bf, t_bf, min_pallas_elements=0))
    ref_bf = jax.block_until_ready(_reference_loss(p_bf, t_bf))
    assert jnp.allclose(total_bf, ref_bf, rtol=1e-3, atol=1e-3), (total_bf, ref_bf)

    print("KERNEL_OK")
</pallas_src>

<mosaic_0001>
module attributes {stable_mosaic.version = 11 : i64} {
  func.func @_sums_kernel(%arg0: i32, %arg1: i32, %arg2: memref<16x128xf32, #tpu.memory_space<vmem>>, %arg3: memref<16x128xf32, #tpu.memory_space<vmem>>, %arg4: memref<1x6x8x128xf32, #tpu.memory_space<vmem>>, %arg5: memref<6x8x128xf32, #tpu.memory_space<vmem>>) attributes {dimension_semantics = [#tpu.dimension_semantics<parallel>, #tpu.dimension_semantics<arbitrary>], iteration_bounds = array<i64: 1, 1>, scalar_prefetch = 0 : i64, scratch_operands = 1 : i64, tpu.core_type = #tpu.core_type<tc>, window_params = [{transform_indices = @transform_0, window_bounds = array<i64: 16, 128>}, {transform_indices = @transform_1, window_bounds = array<i64: 16, 128>}, {transform_indices = @transform_2, window_bounds = array<i64: 1, 6, 8, 128>}]} {
    %c1_i32 = arith.constant 1 : i32
    %0 = arith.muli %arg0, %c1_i32 : i32
    %1 = arith.addi %0, %arg1 : i32
    %c16_i32 = arith.constant 16 : i32
    %2 = arith.muli %1, %c16_i32 : i32
    %c0_i32 = arith.constant 0 : i32
    %3 = arith.cmpi eq, %arg1, %c0_i32 : i32
    %4 = arith.extui %3 : i1 to i32
    %c0_i32_0 = arith.constant 0 : i32
    %5 = arith.cmpi ne, %4, %c0_i32_0 : i32
    scf.if %5 {
      %cst = arith.constant 0.000000e+00 : f32
      %16 = vector.broadcast %cst : f32 to vector<6x8x128xf32>
      %c0 = arith.constant 0 : index
      %c0_7 = arith.constant 0 : index
      %c0_8 = arith.constant 0 : index
      %17 = vector.load %arg5[%c0, %c0_7, %c0_8] : memref<6x8x128xf32, #tpu.memory_space<vmem>>, vector<6x8x128xf32>
      tpu.vector_store %arg5[%c0, %c0_7, %c0_8], %16 {strides = array<i32>} : memref<6x8x128xf32, #tpu.memory_space<vmem>>, vector<6x8x128xf32>,
    } else {
    }
    %c16_i32_1 = arith.constant 16 : i32
    %6 = arith.addi %2, %c16_i32_1 : i32
    %c16_i32_2 = arith.constant 16 : i32
    %7 = arith.cmpi sle, %6, %c16_i32_2 : i32
    %8 = arith.extui %7 : i1 to i32
    %c0_i32_3 = arith.constant 0 : i32
    %9 = arith.cmpi ne, %8, %c0_i32_3 : i32
    scf.if %9 {
      %cst = arith.constant 0.000000e+00 : f32
      %16 = vector.broadcast %cst : f32 to vector<8x128xf32>
      %c0_i32_7 = arith.constant 0 : i32
      %c8_i32 = arith.constant 8 : i32
      %17 = arith.muli %c0_i32_7, %c8_i32 : i32
      %18 = tpu.assume_multiple %17, 8 : i32
      %19 = arith.index_cast %18 : i32 to index
      %c0 = arith.constant 0 : index
      %20 = vector.load %arg2[%19, %c0] : memref<16x128xf32, #tpu.memory_space<vmem>>, vector<8x128xf32>
      %21 = arith.index_cast %18 : i32 to index
      %c0_8 = arith.constant 0 : index
      %22 = vector.load %arg3[%21, %c0_8] : memref<16x128xf32, #tpu.memory_space<vmem>>, vector<8x128xf32>
      %23 = arith.subf %20, %22 : vector<8x128xf32>
      %24 = arith.addf %16, %20 : vector<8x128xf32>
      %25 = arith.addf %16, %22 : vector<8x128xf32>
      %26 = arith.mulf %20, %22 : vector<8x128xf32>
      %27 = arith.addf %16, %26 : vector<8x128xf32>
      %28 = arith.mulf %20, %20 : vector<8x128xf32>
      %29 = arith.addf %16, %28 : vector<8x128xf32>
      %30 = arith.mulf %22, %22 : vector<8x128xf32>
      %31 = arith.addf %16, %30 : vector<8x128xf32>
      %32 = arith.mulf %23, %23 : vector<8x128xf32>
      %33 = arith.addf %16, %32 : vector<8x128xf32>
      %c1_i32_9 = arith.constant 1 : i32
      %c8_i32_10 = arith.constant 8 : i32
      %34 = arith.muli %c1_i32_9, %c8_i32_10 : i32
      %35 = tpu.assume_multiple %34, 8 : i32
      %36 = arith.index_cast %35 : i32 to index
      %c0_11 = arith.constant 0 : index
      %37 = vector.load %arg2[%36, %c0_11] : memref<16x128xf32, #tpu.memory_space<vmem>>, vector<8x128xf32>
      %38 = arith.index_cast %35 : i32 to index
      %c0_12 = arith.constant 0 : index
      %39 = vector.load %arg3[%38, %c0_12] : memref<16x128xf32, #tpu.memory_space<vmem>>, vector<8x128xf32>
      %40 = arith.subf %37, %39 : vector<8x128xf32>
      %41 = arith.addf %24, %37 : vector<8x128xf32>
      %42 = arith.addf %25, %39 : vector<8x128xf32>
      %43 = arith.mulf %37, %39 : vector<8x128xf32>
      %44 = arith.addf %27, %43 : vector<8x128xf32>
      %45 = arith.mulf %37, %37 : vector<8x128xf32>
      %46 = arith.addf %29, %45 : vector<8x128xf32>
      %47 = arith.mulf %39, %39 : vector<8x128xf32>
      %48 = arith.addf %31, %47 : vector<8x128xf32>
      %49 = arith.mulf %40, %40 : vector<8x128xf32>
      %50 = arith.addf %33, %49 : vector<8x128xf32>
      %c2_i32 = arith.constant 2 : i32
      %c0_13 = arith.constant 0 : index
      %c0_14 = arith.constant 0 : index
      %c0_15 = arith.constant 0 : index
      %51 = vector.load %arg5[%c0_13, %c0_14, %c0_15] : memref<6x8x128xf32, #tpu.memory_space<vmem>>, vector<1x8x128xf32>
      %52 = vector.shape_cast %51 : vector<1x8x128xf32> to vector<8x128xf32>
      %53 = arith.addf %52, %41 : vector<8x128xf32>
      %c0_16 = arith.constant 0 : index
      %c0_17 = arith.constant 0 : index
      %c0_18 = arith.constant 0 : index
      %54 = vector.load %arg5[%c0_16, %c0_17, %c0_18] : memref<6x8x128xf32, #tpu.memory_space<vmem>>, vector<1x8x128xf32>
      %55 = vector.shape_cast %54 : vector<1x8x128xf32> to vector<8x128xf32>
      %56 = vector.shape_cast %53 : vector<8x128xf32> to vector<1x8x128xf32>
      tpu.vector_store %arg5[%c0_16, %c0_17, %c0_18], %56 {strides = array<i32>} : memref<6x8x128xf32, #tpu.memory_space<vmem>>, vector<1x8x128xf32>,
      %c1 = arith.constant 1 : index
      %c0_19 = arith.constant 0 : index
      %c0_20 = arith.constant 0 : index
      %57 = vector.load %arg5[%c1, %c0_19, %c0_20] : memref<6x8x128xf32, #tpu.memory_space<vmem>>, vector<1x8x128xf32>
      %58 = vector.shape_cast %57 : vector<1x8x128xf32> to vector<8x128xf32>
      %59 = arith.addf %58, %42 : vector<8x128xf32>
      %c1_21 = arith.constant 1 : index
      %c0_22 = arith.constant 0 : index
      %c0_23 = arith.constant 0 : index
      %60 = vector.load %arg5[%c1_21, %c0_22, %c0_23] : memref<6x8x128xf32, #tpu.memory_space<vmem>>, vector<1x8x128xf32>
      %61 = vector.shape_cast %60 : vector<1x8x128xf32> to vector<8x128xf32>
      %62 = vector.shape_cast %59 : vector<8x128xf32> to vector<1x8x128xf32>
      tpu.vector_store %arg5[%c1_21, %c0_22, %c0_23], %62 {strides = array<i32>} : memref<6x8x128xf32, #tpu.memory_space<vmem>>, vector<1x8x128xf32>,
      %c2 = arith.constant 2 : index
      %c0_24 = arith.constant 0 : index
      %c0_25 = arith.constant 0 : index
      %63 = vector.load %arg5[%c2, %c0_24, %c0_25] : memref<6x8x128xf32, #tpu.memory_space<vmem>>, vector<1x8x128xf32>
      %64 = vector.shape_cast %63 : vector<1x8x128xf32> to vector<8x128xf32>
      %65 = arith.addf %64, %44 : vector<8x128xf32>
      %c2_26 = arith.constant 2 : index
      %c0_27 = arith.constant 0 : index
      %c0_28 = arith.constant 0 : index
      %66 = vector.load %arg5[%c2_26, %c0_27, %c0_28] : memref<6x8x128xf32, #tpu.memory_space<vmem>>, vector<1x8x128xf32>
      %67 = vector.shape_cast %66 : vector<1x8x128xf32> to vector<8x128xf32>
      %68 = vector.shape_cast %65 : vector<8x128xf32> to vector<1x8x128xf32>
      tpu.vector_store %arg5[%c2_26, %c0_27, %c0_28], %68 {strides = array<i32>} : memref<6x8x128xf32, #tpu.memory_space<vmem>>, vector<1x8x128xf32>,
      %c3 = arith.constant 3 : index
      %c0_29 = arith.constant 0 : index
      %c0_30 = arith.constant 0 : index
      %69 = vector.load %arg5[%c3, %c0_29, %c0_30] : memref<6x8x128xf32, #tpu.memory_space<vmem>>, vector<1x8x128xf32>
      %70 = vector.shape_cast %69 : vector<1x8x128xf32> to vector<8x128xf32>
      %71 = arith.addf %70, %46 : vector<8x128xf32>
      %c3_31 = arith.constant 3 : index
      %c0_32 = arith.constant 0 : index
      %c0_33 = arith.constant 0 : index
      %72 = vector.load %arg5[%c3_31, %c0_32, %c0_33] : memref<6x8x128xf32, #tpu.memory_space<vmem>>, vector<1x8x128xf32>
      %73 = vector.shape_cast %72 : vector<1x8x128xf32> to vector<8x128xf32>
      %74 = vector.shape_cast %71 : vector<8x128xf32> to vector<1x8x128xf32>
      tpu.vector_store %arg5[%c3_31, %c0_32, %c0_33], %74 {strides = array<i32>} : memref<6x8x128xf32, #tpu.memory_space<vmem>>, vector<1x8x128xf32>,
      %c4 = arith.constant 4 : index
      %c0_34 = arith.constant 0 : index
      %c0_35 = arith.constant 0 : index
      %75 = vector.load %arg5[%c4, %c0_34, %c0_35] : memref<6x8x128xf32, #tpu.memory_space<vmem>>, vector<1x8x128xf32>
      %76 = vector.shape_cast %75 : vector<1x8x128xf32> to vector<8x128xf32>
      %77 = arith.addf %76, %48 : vector<8x128xf32>
      %c4_36 = arith.constant 4 : index
      %c0_37 = arith.constant 0 : index
      %c0_38 = arith.constant 0 : index
      %78 = vector.load %arg5[%c4_36, %c0_37, %c0_38] : memref<6x8x128xf32, #tpu.memory_space<vmem>>, vector<1x8x128xf32>
      %79 = vector.shape_cast %78 : vector<1x8x128xf32> to vector<8x128xf32>
      %80 = vector.shape_cast %77 : vector<8x128xf32> to vector<1x8x128xf32>
      tpu.vector_store %arg5[%c4_36, %c0_37, %c0_38], %80 {strides = array<i32>} : memref<6x8x128xf32, #tpu.memory_space<vmem>>, vector<1x8x128xf32>,
      %c5 = arith.constant 5 : index
      %c0_39 = arith.constant 0 : index
      %c0_40 = arith.constant 0 : index
      %81 = vector.load %arg5[%c5, %c0_39, %c0_40] : memref<6x8x128xf32, #tpu.memory_space<vmem>>, vector<1x8x128xf32>
      %82 = vector.shape_cast %81 : vector<1x8x128xf32> to vector<8x128xf32>
      %83 = arith.addf %82, %50 : vector<8x128xf32>
      %c5_41 = arith.constant 5 : index
      %c0_42 = arith.constant 0 : index
      %c0_43 = arith.constant 0 : index
      %84 = vector.load %arg5[%c5_41, %c0_42, %c0_43] : memref<6x8x128xf32, #tpu.memory_space<vmem>>, vector<1x8x128xf32>
      %85 = vector.shape_cast %84 : vector<1x8x128xf32> to vector<8x128xf32>
      %86 = vector.shape_cast %83 : vector<8x128xf32> to vector<1x8x128xf32>
      tpu.vector_store %arg5[%c5_41, %c0_42, %c0_43], %86 {strides = array<i32>} : memref<6x8x128xf32, #tpu.memory_space<vmem>>, vector<1x8x128xf32>,
    } else {
    }
    %true = arith.constant true
    %10 = arith.xori %7, %true : i1
    %11 = arith.extui %10 : i1 to i32
    %c0_i32_4 = arith.constant 0 : i32
    %12 = arith.cmpi ne, %11, %c0_i32_4 : i32
    scf.if %12 {
      %cst = arith.constant 0.000000e+00 : f32
      %16 = vector.broadcast %cst : f32 to vector<8x128xf32>
      %17 = tpu.iota {dimensions = array<i32: 0>} : vector<8x128xi32>
      %c0_i32_7 = arith.constant 0 : i32
      %c8_i32 = arith.constant 8 : i32
      %18 = arith.muli %c0_i32_7, %c8_i32 : i32
      %19 = tpu.assume_multiple %18, 8 : i32
      %20 = arith.index_cast %19 : i32 to index
      %c0 = arith.constant 0 : index
      %21 = vector.load %arg2[%20, %c0] : memref<16x128xf32, #tpu.memory_space<vmem>>, vector<8x128xf32>
      %22 = arith.index_cast %19 : i32 to index
      %c0_8 = arith.constant 0 : index
      %23 = vector.load %arg3[%22, %c0_8] : memref<16x128xf32, #tpu.memory_space<vmem>>, vector<8x128xf32>
      %24 = arith.addi %2, %19 : i32
      %25 = vector.broadcast %24 : i32 to vector<8x128xi32>
      %26 = arith.addi %25, %17 : vector<8x128xi32>
      %c16_i32_9 = arith.constant 16 : i32
      %27 = vector.broadcast %c16_i32_9 : i32 to vector<8x128xi32>
      %28 = arith.cmpi slt, %26, %27 : vector<8x128xi32>
      %cst_10 = arith.constant 0.000000e+00 : f32
      %29 = vector.broadcast %cst_10 : f32 to vector<8x128xf32>
      %30 = arith.select %28, %21, %29 : vector<8x128xi1>, vector<8x128xf32>
      %cst_11 = arith.constant 0.000000e+00 : f32
      %31 = vector.broadcast %cst_11 : f32 to vector<8x128xf32>
      %32 = arith.select %28, %23, %31 : vector<8x128xi1>, vector<8x128xf32>
      %33 = arith.subf %30, %32 : vector<8x128xf32>
      %34 = arith.addf %16, %30 : vector<8x128xf32>
      %35 = arith.addf %16, %32 : vector<8x128xf32>
      %36 = arith.mulf %30, %32 : vector<8x128xf32>
      %37 = arith.addf %16, %36 : vector<8x128xf32>
      %38 = arith.mulf %30, %30 : vector<8x128xf32>
      %39 = arith.addf %16, %38 : vector<8x128xf32>
      %40 = arith.mulf %32, %32 : vector<8x128xf32>
      %41 = arith.addf %16, %40 : vector<8x128xf32>
      %42 = arith.mulf %33, %33 : vector<8x128xf32>
      %43 = arith.addf %16, %42 : vector<8x128xf32>
      %c1_i32_12 = arith.constant 1 : i32
      %c8_i32_13 = arith.constant 8 : i32
      %44 = arith.muli %c1_i32_12, %c8_i32_13 : i32
      %45 = tpu.assume_multiple %44, 8 : i32
      %46 = arith.index_cast %45 : i32 to index
      %c0_14 = arith.constant 0 : index
      %47 = vector.load %arg2[%46, %c0_14] : memref<16x128xf32, #tpu.memory_space<vmem>>, vector<8x128xf32>
      %48 = arith.index_cast %45 : i32 to index
      %c0_15 = arith.constant 0 : index
      %49 = vector.load %arg3[%48, %c0_15] : memref<16x128xf32, #tpu.memory_space<vmem>>, vector<8x128xf32>
      %50 = arith.addi %2, %45 : i32
      %51 = vector.broadcast %50 : i32 to vector<8x128xi32>
      %52 = arith.addi %51, %17 : vector<8x128xi32>
      %c16_i32_16 = arith.constant 16 : i32
      %53 = vector.broadcast %c16_i32_16 : i32 to vector<8x128xi32>
      %54 = arith.cmpi slt, %52, %53 : vector<8x128xi32>
      %cst_17 = arith.constant 0.000000e+00 : f32
      %55 = vector.broadcast %cst_17 : f32 to vector<8x128xf32>
      %56 = arith.select %54, %47, %55 : vector<8x128xi1>, vector<8x128xf32>
      %cst_18 = arith.constant 0.000000e+00 : f32
      %57 = vector.broadcast %cst_18 : f32 to vector<8x128xf32>
      %58 = arith.select %54, %49, %57 : vector<8x128xi1>, vector<8x128xf32>
      %59 = arith.subf %56, %58 : vector<8x128xf32>
      %60 = arith.addf %34, %56 : vector<8x128xf32>
      %61 = arith.addf %35, %58 : vector<8x128xf32>
      %62 = arith.mulf %56, %58 : vector<8x128xf32>
      %63 = arith.addf %37, %62 : vector<8x128xf32>
      %64 = arith.mulf %56, %56 : vector<8x128xf32>
      %65 = arith.addf %39, %64 : vector<8x128xf32>
      %66 = arith.mulf %58, %58 : vector<8x128xf32>
      %67 = arith.addf %41, %66 : vector<8x128xf32>
      %68 = arith.mulf %59, %59 : vector<8x128xf32>
      %69 = arith.addf %43, %68 : vector<8x128xf32>
      %c2_i32 = arith.constant 2 : i32
      %c0_19 = arith.constant 0 : index
      %c0_20 = arith.constant 0 : index
      %c0_21 = arith.constant 0 : index
      %70 = vector.load %arg5[%c0_19, %c0_20, %c0_21] : memref<6x8x128xf32, #tpu.memory_space<vmem>>, vector<1x8x128xf32>
      %71 = vector.shape_cast %70 : vector<1x8x128xf32> to vector<8x128xf32>
      %72 = arith.addf %71, %60 : vector<8x128xf32>
      %c0_22 = arith.constant 0 : index
      %c0_23 = arith.constant 0 : index
      %c0_24 = arith.constant 0 : index
      %73 = vector.load %arg5[%c0_22, %c0_23, %c0_24] : memref<6x8x128xf32, #tpu.memory_space<vmem>>, vector<1x8x128xf32>
      %74 = vector.shape_cast %73 : vector<1x8x128xf32> to vector<8x128xf32>
      %75 = vector.shape_cast %72 : vector<8x128xf32> to vector<1x8x128xf32>
      tpu.vector_store %arg5[%c0_22, %c0_23, %c0_24], %75 {strides = array<i32>} : memref<6x8x128xf32, #tpu.memory_space<vmem>>, vector<1x8x128xf32>,
      %c1 = arith.constant 1 : index
      %c0_25 = arith.constant 0 : index
      %c0_26 = arith.constant 0 : index
      %76 = vector.load %arg5[%c1, %c0_25, %c0_26] : memref<6x8x128xf32, #tpu.memory_space<vmem>>, vector<1x8x128xf32>
      %77 = vector.shape_cast %76 : vector<1x8x128xf32> to vector<8x128xf32>
      %78 = arith.addf %77, %61 : vector<8x128xf32>
      %c1_27 = arith.constant 1 : index
      %c0_28 = arith.constant 0 : index
      %c0_29 = arith.constant 0 : index
      %79 = vector.load %arg5[%c1_27, %c0_28, %c0_29] : memref<6x8x128xf32, #tpu.memory_space<vmem>>, vector<1x8x128xf32>
      %80 = vector.shape_cast %79 : vector<1x8x128xf32> to vector<8x128xf32>
      %81 = vector.shape_cast %78 : vector<8x128xf32> to vector<1x8x128xf32>
      tpu.vector_store %arg5[%c1_27, %c0_28, %c0_29], %81 {strides = array<i32>} : memref<6x8x128xf32, #tpu.memory_space<vmem>>, vector<1x8x128xf32>,
      %c2 = arith.constant 2 : index
      %c0_30 = arith.constant 0 : index
      %c0_31 = arith.constant 0 : index
      %82 = vector.load %arg5[%c2, %c0_30, %c0_31] : memref<6x8x128xf32, #tpu.memory_space<vmem>>, vector<1x8x128xf32>
      %83 = vector.shape_cast %82 : vector<1x8x128xf32> to vector<8x128xf32>
      %84 = arith.addf %83, %63 : vector<8x128xf32>
      %c2_32 = arith.constant 2 : index
      %c0_33 = arith.constant 0 : index
      %c0_34 = arith.constant 0 : index
      %85 = vector.load %arg5[%c2_32, %c0_33, %c0_34] : memref<6x8x128xf32, #tpu.memory_space<vmem>>, vector<1x8x128xf32>
      %86 = vector.shape_cast %85 : vector<1x8x128xf32> to vector<8x128xf32>
      %87 = vector.shape_cast %84 : vector<8x128xf32> to vector<1x8x128xf32>
      tpu.vector_store %arg5[%c2_32, %c0_33, %c0_34], %87 {strides = array<i32>} : memref<6x8x128xf32, #tpu.memory_space<vmem>>, vector<1x8x128xf32>,
      %c3 = arith.constant 3 : index
      %c0_35 = arith.constant 0 : index
      %c0_36 = arith.constant 0 : index
      %88 = vector.load %arg5[%c3, %c0_35, %c0_36] : memref<6x8x128xf32, #tpu.memory_space<vmem>>, vector<1x8x128xf32>
      %89 = vector.shape_cast %88 : vector<1x8x128xf32> to vector<8x128xf32>
      %90 = arith.addf %89, %65 : vector<8x128xf32>
      %c3_37 = arith.constant 3 : index
      %c0_38 = arith.constant 0 : index
      %c0_39 = arith.constant 0 : index
      %91 = vector.load %arg5[%c3_37, %c0_38, %c0_39] : memref<6x8x128xf32, #tpu.memory_space<vmem>>, vector<1x8x128xf32>
      %92 = vector.shape_cast %91 : vector<1x8x128xf32> to vector<8x128xf32>
      %93 = vector.shape_cast %90 : vector<8x128xf32> to vector<1x8x128xf32>
      tpu.vector_store %arg5[%c3_37, %c0_38, %c0_39], %93 {strides = array<i32>} : memref<6x8x128xf32, #tpu.memory_space<vmem>>, vector<1x8x128xf32>,
      %c4 = arith.constant 4 : index
      %c0_40 = arith.constant 0 : index
      %c0_41 = arith.constant 0 : index
      %94 = vector.load %arg5[%c4, %c0_40, %c0_41] : memref<6x8x128xf32, #tpu.memory_space<vmem>>, vector<1x8x128xf32>
      %95 = vector.shape_cast %94 : vector<1x8x128xf32> to vector<8x128xf32>
      %96 = arith.addf %95, %67 : vector<8x128xf32>
      %c4_42 = arith.constant 4 : index
      %c0_43 = arith.constant 0 : index
      %c0_44 = arith.constant 0 : index
      %97 = vector.load %arg5[%c4_42, %c0_43, %c0_44] : memref<6x8x128xf32, #tpu.memory_space<vmem>>, vector<1x8x128xf32>
      %98 = vector.shape_cast %97 : vector<1x8x128xf32> to vector<8x128xf32>
      %99 = vector.shape_cast %96 : vector<8x128xf32> to vector<1x8x128xf32>
      tpu.vector_store %arg5[%c4_42, %c0_43, %c0_44], %99 {strides = array<i32>} : memref<6x8x128xf32, #tpu.memory_space<vmem>>, vector<1x8x128xf32>,
      %c5 = arith.constant 5 : index
      %c0_45 = arith.constant 0 : index
      %c0_46 = arith.constant 0 : index
      %100 = vector.load %arg5[%c5, %c0_45, %c0_46] : memref<6x8x128xf32, #tpu.memory_space<vmem>>, vector<1x8x128xf32>
      %101 = vector.shape_cast %100 : vector<1x8x128xf32> to vector<8x128xf32>
      %102 = arith.addf %101, %69 : vector<8x128xf32>
      %c5_47 = arith.constant 5 : index
      %c0_48 = arith.constant 0 : index
      %c0_49 = arith.constant 0 : index
      %103 = vector.load %arg5[%c5_47, %c0_48, %c0_49] : memref<6x8x128xf32, #tpu.memory_space<vmem>>, vector<1x8x128xf32>
      %104 = vector.shape_cast %103 : vector<1x8x128xf32> to vector<8x128xf32>
      %105 = vector.shape_cast %102 : vector<8x128xf32> to vector<1x8x128xf32>
      tpu.vector_store %arg5[%c5_47, %c0_48, %c0_49], %105 {strides = array<i32>} : memref<6x8x128xf32, #tpu.memory_space<vmem>>, vector<1x8x128xf32>,
    } else {
    }
    %c0_i32_5 = arith.constant 0 : i32
    %13 = arith.cmpi eq, %arg1, %c0_i32_5 : i32
    %14 = arith.extui %13 : i1 to i32
    %c0_i32_6 = arith.constant 0 : i32
    %15 = arith.cmpi ne, %14, %c0_i32_6 : i32
    scf.if %15 {
      %c0 = arith.constant 0 : index
      %c0_7 = arith.constant 0 : index
      %c0_8 = arith.constant 0 : index
      %16 = vector.load %arg5[%c0, %c0_7, %c0_8] : memref<6x8x128xf32, #tpu.memory_space<vmem>>, vector<6x8x128xf32>
      %c0_9 = arith.constant 0 : index
      %c0_10 = arith.constant 0 : index
      %c0_11 = arith.constant 0 : index
      %c0_12 = arith.constant 0 : index
      %17 = vector.load %arg4[%c0_9, %c0_10, %c0_11, %c0_12] : memref<1x6x8x128xf32, #tpu.memory_space<vmem>>, vector<1x6x8x128xf32>
      %18 = vector.shape_cast %17 : vector<1x6x8x128xf32> to vector<6x8x128xf32>
      %19 = vector.shape_cast %16 : vector<6x8x128xf32> to vector<1x6x8x128xf32>
      tpu.vector_store %arg4[%c0_9, %c0_10, %c0_11, %c0_12], %19 {strides = array<i32>} : memref<1x6x8x128xf32, #tpu.memory_space<vmem>>, vector<1x6x8x128xf32>,
    } else {
    }
    return
  }
  func.func @transform_0(%arg0: i32, %arg1: i32) -> (i32, i32) {
    %c1_i32 = arith.constant 1 : i32
    %0 = arith.muli %arg0, %c1_i32 : i32
    %1 = arith.addi %0, %arg1 : i32
    %c0_i32 = arith.constant 0 : i32
    %2 = arith.minsi %1, %c0_i32 : i32
    %c0_i32_0 = arith.constant 0 : i32
    %c0_i32_1 = arith.constant 0 : i32
    return %2, %c0_i32_0 : i32, i32
  }
  func.func @transform_1(%arg0: i32, %arg1: i32) -> (i32, i32) {
    %c1_i32 = arith.constant 1 : i32
    %0 = arith.muli %arg0, %c1_i32 : i32
    %1 = arith.addi %0, %arg1 : i32
    %c0_i32 = arith.constant 0 : i32
    %2 = arith.minsi %1, %c0_i32 : i32
    %c0_i32_0 = arith.constant 0 : i32
    %c0_i32_1 = arith.constant 0 : i32
    return %2, %c0_i32_0 : i32, i32
  }
  func.func @transform_2(%arg0: i32, %arg1: i32) -> (i32, i32, i32, i32) {
    %c0_i32 = arith.constant 0 : i32
    %c0_i32_0 = arith.constant 0 : i32
    %c0_i32_1 = arith.constant 0 : i32
    %c0_i32_2 = arith.constant 0 : i32
    return %arg0, %c0_i32, %c0_i32_0, %c0_i32_1 : i32, i32, i32, i32
  }
}

</mosaic_0001>

<bundles_post_ra>
// kernel: tpu_custom_call.1
= control target key start
LH: loop header
LB: loop body
LE: loop exit
PB: predicated region body
PF: predicated region fallthrough
CT: control target
= control target key end

     0   :  { %7 = vsyncpa [#allocation4], 0  ;;  %s376_s0 = inlined_call_operand.hbm [shape: f32[16,128], index: 0, kind: input, shape index: {}]   ;;  %s377_s1 = inlined_call_operand.hbm [shape: f32[16,128], index: 1, kind: input, shape index: {}]   ;;  %s378_s2 = inlined_call_operand.hbm [shape: f32[1,6,8,128], index: 2, kind: output, shape index: {}]  }
   0x1   :  { %8 = vsyncpa [#allocation7], 0 }
   0x2   :  { %9 = vsyncpa [#allocation5], 0  ;;  %s311_s9 = smov [#allocation3]   ;;  %s239_s13 = scalar_lea.hbm %s376_s0, 256 }
   0x3   :  { %s21_s10 = sshll.u32 %s311_s9, 4  ;;  %p240_p0 = scmp.ne.s32.totalorder %s376_s0, %s239_s13  ;;  %s22_s10 = int_to_ptr.vmem [resolvable:$true] %s21_s10 }
   0x4   :  { %p243_p1 = scmp.lt.u32.totalorder %s239_s13, %s376_s0 }
   0x6   :  { %p245_p2 = pnand %p243_p1, %p240_p0 }
   0x8   :  { %248 = shalt.err (!%p245_p2)
}
   0x9   :  { %s249_s18 = scalar_lea.vmem %s22_s10, 256  ;;  %p254_p4 = scmp.lt.s32.totalorder %s22_s10, %s22_s10 }
   0xa   :  { %p250_p3 = scmp.ne.s32.totalorder %s22_s10, %s249_s18  ;;  %p255_p5 = scmp.lt.s32.totalorder %s249_s18, %s249_s18 }
   0xc   :  { %p256_p6 = por %p255_p5, %p254_p4 }
   0xe   :  { %p257_p7 = pnand %p256_p6, %p250_p3 }
  0x10   :  { %260 = shalt.err (!%p257_p7)
}
  0x11   :  { %s312_s19 = smov 128   ;;  %s313_s20 = smov 8  }
  0x12   :  { %27 = dma.hbm_to_vmem [thread:$0]  %s376_s0, 256, %s22_s10, [#allocation4], %s312_s19, %s312_s19, %s313_s20  }
  0x13   :  { %s314_s23 = smov [#allocation6]   ;;  %s261_s27 = scalar_lea.hbm %s377_s1, 256 }
  0x14   :  { %s39_s24 = sshll.u32 %s314_s23, 4  ;;  %p262_p8 = scmp.ne.s32.totalorder %s377_s1, %s261_s27  ;;  %s40_s24 = int_to_ptr.vmem [resolvable:$true] %s39_s24 }
  0x15   :  { %p265_p9 = scmp.lt.u32.totalorder %s261_s27, %s377_s1 }
  0x17   :  { %p267_p10 = pnand %p265_p9, %p262_p8 }
  0x19   :  { %270 = shalt.err (!%p267_p10)
}
  0x1a   :  { %s271_s4 = scalar_lea.vmem %s40_s24, 256  ;;  %p276_p12 = scmp.lt.s32.totalorder %s40_s24, %s40_s24 }
  0x1b   :  { %p272_p11 = scmp.ne.s32.totalorder %s40_s24, %s271_s4  ;;  %p277_p13 = scmp.lt.s32.totalorder %s271_s4, %s271_s4 }
  0x1d   :  { %p278_p0 = por %p277_p13, %p276_p12 }
  0x1f   :  { %p279_p1 = pnand %p278_p0, %p272_p11 }
  0x21   :  { %282 = shalt.err (!%p279_p1)
}
  0x22   :  { %45 = dma.hbm_to_vmem [thread:$0]  %s377_s1, 256, %s40_s24, [#allocation7], %s312_s19, %s312_s19, %s313_s20  }
  0x23   :  { %305 = dma.done.wait [#allocation4], 256  }
  0x24   :  { %306 = vsyncadd [#allocation4], 4294967040 }
  0x25   :  { %307 = dma.done.wait [#allocation7], 256  }
  0x26   :  { %308 = vsyncadd [#allocation7], 4294967040  ;;  %v77_v0 = vld [vmem:[#allocation3] sm:$0xff]  ;;  %v91_v1 = vld [vmem:[#allocation3 + $0x8] sm:$0xff]  ;;  %s315_s1 = smov [#allocation8]  }
  0x27   :  { %v78_v2 = vld [vmem:[#allocation6] sm:$0xff]  ;;  %v95_v3 = vadd.f32 %v91_v1, %v77_v0  ;;  %v93_v4 = vld [vmem:[#allocation6 + $0x8] sm:$0xff]  ;;  %v84_v6 = vmul.f32 %v77_v0, %v77_v0  ;;  %v99_v7 = vmul.f32 %v91_v1, %v91_v1  ;;  %s217_s6 = sshll.u32 %s315_s1, 4  ;;  %s218_s6 = int_to_ptr.vmem [resolvable:$true] %s217_s6 }
  0x28   :  { %v82_v5 = vmul.f32 %v78_v2, %v77_v0  ;;  %v96_v8 = vadd.f32 %v93_v4, %v78_v2  ;;  %v97_v9 = vmul.f32 %v93_v4, %v91_v1  ;;  %v86_v10 = vmul.f32 %v78_v2, %v78_v2  ;;  %s283_s7 = scalar_lea.vmem %s218_s6, 768  ;;  %p288_p3 = scmp.lt.s32.totalorder %s218_s6, %s218_s6 }
  0x29   :  { %v101_v11 = vmul.f32 %v93_v4, %v93_v4  ;;  %206 = vst [vmem:[#allocation8] sm:$0xff] %v95_v3  ;;  %v100_v12 = vadd.f32 %v99_v7, %v84_v6  ;;  %v79_v13 = vsub.f32 %v77_v0, %v78_v2  ;;  %v94_v14 = vsub.f32 %v91_v1, %v93_v4  ;;  %p284_p2 = scmp.ne.s32.totalorder %s218_s6, %s283_s7  ;;  %p289_p4 = scmp.lt.s32.totalorder %s283_s7, %s283_s7 }
  0x2a   :  { %207 = vst [vmem:[#allocation8 + $0x8] sm:$0xff] %v96_v8  ;;  %v98_v15 = vadd.f32 %v97_v9, %v82_v5 }
  0x2b   :  { %v102_v16 = vadd.f32 %v101_v11, %v86_v10  ;;  %209 = vst [vmem:[#allocation8 + $0x18] sm:$0xff] %v100_v12  ;;  %v88_v17 = vmul.f32 %v79_v13, %v79_v13  ;;  %v103_v18 = vmul.f32 %v94_v14, %v94_v14  ;;  %p290_p5 = por %p289_p4, %p288_p3 }
  0x2c   :  { %208 = vst [vmem:[#allocation8 + $0x10] sm:$0xff] %v98_v15 }
  0x2d   :  { %210 = vst [vmem:[#allocation8 + $0x20] sm:$0xff] %v102_v16  ;;  %v104_v19 = vadd.f32 %v103_v18, %v88_v17  ;;  %p291_p6 = pnand %p290_p5, %p284_p2 }
  0x2f   :  { %211 = vst [vmem:[#allocation8 + $0x28] sm:$0xff] %v104_v19 }
  0x30   :  { %294 = shalt.err (!%p291_p6)
}
  0x31   :  { %s295_s10 = scalar_lea.hbm %s378_s2, 768 }
  0x32   :  { %p296_p7 = scmp.ne.s32.totalorder %s378_s2, %s295_s10  ;;  %p299_p8 = scmp.lt.u32.totalorder %s295_s10, %s378_s2 }
  0x34   :  { %p301_p9 = pnand %p299_p8, %p296_p7 }
  0x36   :  { %304 = shalt.err (!%p301_p9)
}
  0x37   :  { %223 = dma.vmem_to_hbm [thread:$0]  %s218_s6, 768, %s378_s2, [#allocation5], %s312_s19, %s312_s19, %s313_s20  }
  0x38   :  { %309 = dma.done.wait [#allocation5], 768  }
  0x39   :  { %310 = vsyncadd [#allocation5], 4294966528 }
  0x3a   :  { %227 = vsyncpa [#allocation4], 1 }
  0x3b   :  { %228 = vsyncpa [#allocation7], 1 }
  0x3c   :  { %229 = vsyncpa [#allocation5], 1 }

</bundles_post_ra>
